<compile_context>
chip_gen: v5e
topology: v5e:2x2
jax: 0.10.0
libtpu: 0.0.40
codegen_flags: <defaults>
</compile_context>

<pallas_src>
import math
import jax
import jax.numpy as jnp
from jax.experimental import pallas as pl
from jax.experimental.pallas import tpu as pltpu


# ---------------- Group: cyclic rotation group C_n ----------------
class CyclicGroup:
    def __init__(self, order):
        self.order = order
        self.identity = jnp.array(0.0, dtype=jnp.float32)

    def elements(self):
        return jnp.linspace(0.0, 2.0 * math.pi * (self.order - 1) / self.order,
                            self.order, dtype=jnp.float32)

    def product(self, h1, h2):
        return jnp.remainder(h1 + h2, 2.0 * math.pi)

    def inverse(self, h):
        return jnp.remainder(-h, 2.0 * math.pi)

    def matrix_representation(self, h):
        c, s = jnp.cos(h), jnp.sin(h)
        return jnp.stack([jnp.stack([c, -s]), jnp.stack([s, c])])

    def left_action_on_R2(self, h, grid):
        # grid: [2, k, k]
        return jnp.tensordot(self.matrix_representation(h), grid, axes=1)

    def normalize_group_elements(self, h):
        largest = 2.0 * math.pi * (self.order - 1) / self.order
        return 2.0 * h / largest - 1.0


# ------------- Transformed grid over R^2 x H (buffer setup) -------------
def create_transformed_grid_R2xH(group, kernel_size):
    k = kernel_size
    num = group.order
    lin = jnp.linspace(-1.0, 1.0, k, dtype=jnp.float32)
    grid_R2 = jnp.stack(jnp.meshgrid(lin, lin, indexing="ij"))          # [2, k, k]
    grid_H = group.elements()                                           # [num]

    inv_elems = group.inverse(group.elements())                         # [num]
    t_R2 = jnp.stack([group.left_action_on_R2(g, grid_R2) for g in inv_elems],
                     axis=1)                                            # [2, num, k, k]
    t_H = jnp.stack([group.product(g, grid_H) for g in inv_elems], axis=1)  # [num, num]
    t_H = group.normalize_group_elements(t_H)

    part_R2 = jnp.tile(t_R2.reshape(2, num, 1, k, k), (1, 1, num, 1, 1))
    part_H = jnp.tile(t_H.reshape(1, num, num, 1, 1), (1, 1, 1, k, k))
    return jnp.concatenate([part_R2, part_H], axis=0)                   # [3, num, num, k, k]


# ------------- Trilinear interpolation (interp3d equivalent) -------------
# TODO(synk): exact interp3d coordinate convention was not provided; this follows
# grid_sample-style trilinear interpolation, align_corners=True, zero padding.
def interp3d(signal, grid):
    # signal: [C, D, Hk, Wk]; grid: [3, D', H', W'] with coords in [-1, 1]
    # grid[0] -> Hk axis, grid[1] -> Wk axis, grid[2] -> D (group) axis
    C, D, Hk, Wk = signal.shape
    gi = (grid[0] + 1.0) * 0.5 * (Hk - 1)
    gj = (grid[1] + 1.0) * 0.5 * (Wk - 1)
    gd = (grid[2] + 1.0) * 0.5 * (D - 1)

    d0 = jnp.floor(gd).astype(jnp.int32); d1 = d0 + 1
    i0 = jnp.floor(gi).astype(jnp.int32); i1 = i0 + 1
    j0 = jnp.floor(gj).astype(jnp.int32); j1 = j0 + 1
    wd, wi, wj = gd - d0, gi - i0, gj - j0

    def gather(d_idx, i_idx, j_idx):
        valid = ((d_idx >= 0) & (d_idx < D) & (i_idx >= 0) & (i_idx < Hk)
                 & (j_idx >= 0) & (j_idx < Wk))
        d_c = jnp.clip(d_idx, 0, D - 1)
        i_c = jnp.clip(i_idx, 0, Hk - 1)
        j_c = jnp.clip(j_idx, 0, Wk - 1)
        vals = signal[:, d_c, i_c, j_c]            # [C, D', H', W']
        return vals * valid.astype(signal.dtype)

    out = jnp.zeros((C,) + grid.shape[1:], dtype=signal.dtype)
    for dd, wdd in ((d0, 1.0 - wd), (d1, wd)):
        for ii, wii in ((i0, 1.0 - wi), (i1, wi)):
            for jj, wjj in ((j0, 1.0 - wj), (j1, wj)):
                out = out + gather(dd, ii, jj) * (wdd * wii * wjj)
    return out


# ------------- InterpolativeGroupKernel2d.sample() -------------
def sample_group_kernels(weight, transformed_grid, group, kernel_size):
    # weight: [out, in, num, k, k] -> filter bank [out, num, in, num, k, k]
    num = group.order
    k = kernel_size
    out_ch, in_ch = weight.shape[0], weight.shape[1]
    w = weight.reshape(out_ch * in_ch, num, k, k)
    tw = jnp.stack([interp3d(w, transformed_grid[:, gi]) for gi in range(num)])
    tw = tw.reshape(num, out_ch, in_ch, num, k, k)
    tw = jnp.transpose(tw, (1, 0, 2, 3, 4, 5))
    return tw


# ------------- small helpers -------------
def _round_up(x, m):
    return ((x + m - 1) // m) * m


def _vmem_budget_bytes():
    # Generation-aware VMEM ceiling: ~96 MiB on v5e/v6e (128 MiB physical),
    # ~48 MiB on v7x (64 MiB physical). Falls back to a safe 48 MiB.
    try:
        cap = int(pltpu.get_tpu_info().vmem_capacity_bytes)
    except Exception:
        cap = 64 * 1024 * 1024
    return min((cap * 3) // 4, 100 * 1024 * 1024)


def _pick_batch_block(B, Cin, Cout, K, HpWp_ext, L_pad, itemsize, vmem_budget):
    # Target >= ~8 grid steps (DMA/compute overlap + v7x dual-TC sharding of the
    # "parallel" batch axis), then shrink bb until the per-step VMEM fits.
    target_steps = 8
    bb = max(1, B // target_steps)
    while bb > 1 and B % bb != 0:
        bb -= 1

    def step_bytes(b):
        return itemsize * (2 * b * Cin * HpWp_ext       # input blocks (double-buffered)
                           + 2 * b * Cout * L_pad       # output blocks (double-buffered)
                           + K * b * L_pad              # im2col patch scratch
                           + 2 * Cout * K)              # weight tile

    while bb > 1 and step_bytes(bb) > vmem_budget:
        bb -= 1
        while bb > 1 and B % bb != 0:
            bb -= 1
    return bb


# ------------- Pallas conv2d (the hot path) -------------
def conv2d_pallas(x_nchw, w_oihw, padding, compute_dtype=jnp.float32):
    """Stride-1, zero-padded 2D conv: NCHW activations, OIHW weights, NCHW output.

    Per grid step the kernel builds an im2col patch matrix directly in a VMEM
    scratch (K = kh*kw*Cin rows, bb*L_pad lane-dense columns) and runs a single
    MXU matmul against the (Cout, K) weight, producing lane-dense (Cout, L_pad)
    output slabs for bb batch elements.
    """
    B, Cin, H, W = x_nchw.shape
    Cout, _, kh, kw = w_oihw.shape
    Hp, Wp = H + 2 * padding, W + 2 * padding
    Ho, Wo = Hp - kh + 1, Wp - kw + 1
    K = kh * kw * Cin

    # Flattened output extent: last valid output sits at flat index
    # (Ho-1)*Wp + (Wo-1).  Pad the lane extent to a multiple of 128 so both the
    # patch-scratch stores and the output writeback are unmasked lane-dense.
    L = (Ho - 1) * Wp + Wo
    L_pad = _round_up(L, 128)

    # Pad the input ONCE (conv halo + enough extra zero rows that every tap
    # slice [off : off + L_pad] stays in-bounds), then flatten spatial on lanes.
    max_off = (kh - 1) * Wp + (kw - 1)
    extra = max(0, max_off + L_pad - Hp * Wp)
    extra_rows = (extra + Wp - 1) // Wp
    Hp_ext = Hp + extra_rows
    HpWp_ext = Hp_ext * Wp
    x_pad = jnp.pad(x_nchw, ((0, 0), (0, 0),
                             (padding, padding + extra_rows),
                             (padding, padding)))
    x_flat = x_pad.reshape(B, Cin, HpWp_ext)        # NCHW kept, spatial flattened on lanes

    # im2col weight: column index = (i*kw + j)*Cin + c (tap-major, matches kernel).
    # TODO(synk): at production channel counts pass compute_dtype=jnp.bfloat16
    # (native MXU on v5e/v6e/v7x, halves DMA bytes + VMEM); kept f32 here to
    # honor the 1e-4 parity check against a Precision.HIGHEST reference.
    w_im2col = jnp.transpose(w_oihw, (0, 2, 3, 1)).reshape(Cout, K).astype(compute_dtype)

    vmem_budget = _vmem_budget_bytes()
    itemsize = jnp.dtype(compute_dtype).itemsize
    bb = _pick_batch_block(B, Cin, Cout, K, HpWp_ext, L_pad, max(itemsize, 4), vmem_budget)
    grid = (B // bb,)
    # TODO(synk): for production H,W add a second grid axis over output-row
    # blocks (multiple-of-8 rows + kh-1 halo) so the per-step input block and
    # the K-times-larger patch scratch fit v7x's 64 MiB VMEM.

    def conv_kernel(x_ref, w_ref, o_ref, patches_ref):
        # Build the im2col patch matrix directly in VMEM scratch (no concatenate
        # copy): each tap is a lane-shifted view of the flattened padded image
        # stored at its static (sublane, lane) offset.  Stores are aligned and
        # unmasked because L_pad % 128 == 0 and the input was padded so
        # off + L_pad never runs past the end.
        for b in range(bb):                              # static; each iter ends in a store
            for t in range(kh * kw):
                i, j = divmod(t, kw)
                off = i * Wp + j
                patches_ref[t * Cin:(t + 1) * Cin,
                            b * L_pad:(b + 1) * L_pad] = (
                    x_ref[b, :, off:off + L_pad].astype(compute_dtype))
        # One fused MXU matmul for all bb batch slabs:
        # (Cout, K) @ (K, bb*L_pad) -> lane-dense (Cout, bb*L_pad).
        out = jnp.dot(w_ref[...], patches_ref[...],
                      preferred_element_type=jnp.float32).astype(o_ref.dtype)
        for b in range(bb):                              # lane-aligned static slices
            o_ref[b, :, :] = out[:, b * L_pad:(b + 1) * L_pad]

    cost = pl.CostEstimate(
        flops=2 * B * Cout * K * L_pad,
        transcendentals=0,
        bytes_accessed=4 * (B * Cin * HpWp_ext + Cout * K + B * Cout * L_pad),
    )

    y_flat = pl.pallas_call(
        conv_kernel,
        out_shape=jax.ShapeDtypeStruct((B, Cout, L_pad), x_nchw.dtype),
        grid=grid,
        in_specs=[
            pl.BlockSpec((bb, Cin, HpWp_ext), lambda g: (g, 0, 0)),
            pl.BlockSpec((Cout, K), lambda g: (0, 0)),
        ],
        out_specs=pl.BlockSpec((bb, Cout, L_pad), lambda g: (g, 0, 0)),
        scratch_shapes=[pltpu.VMEM((K, bb * L_pad), compute_dtype)],
        compiler_params=pltpu.CompilerParams(
            dimension_semantics=("parallel",),   # batch blocks independent (v7x: 2 TCs)
            vmem_limit_bytes=vmem_budget,
        ),
        cost_estimate=cost,
    )(x_flat, w_im2col)

    # Crop the flattened output back to (B, Cout, Ho, Wo): valid outputs live at
    # flat index oy*Wp + ox (ox < Wo); drop/pad the tail, reshape, drop the W halo.
    HoWp = Ho * Wp
    if L_pad >= HoWp:
        y_full = y_flat[:, :, :HoWp]
    else:
        y_full = jnp.pad(y_flat, ((0, 0), (0, 0), (0, HoWp - L_pad)))
    y = y_full.reshape(B, Cout, Ho, Wp)[:, :, :, :Wo]
    return y


# ------------- GroupConv2D.forward -------------
def group_conv2d_forward(x, weight, transformed_grid, group, kernel_size, padding):
    # x: [B, in_channels, num_group_elements, H, W]
    B, in_ch, num, H, W = x.shape
    out_ch = weight.shape[0]
    x2 = x.reshape(B, in_ch * num, H, W)
    kernels = sample_group_kernels(weight, transformed_grid, group, kernel_size)
    w2 = kernels.reshape(out_ch * num, in_ch * num, kernel_size, kernel_size)
    y = conv2d_pallas(x2, w2, padding)                       # [B, out*num, Ho, Wo]
    # Mirror torch exactly: x.view(-1, out, num, x.shape[-1], x.shape[-2]).
    # (The torch module labels the last two axes as (W, H) without a transpose;
    #  we reproduce that quirk for semantic parity — it matters only when H != W.)
    y = y.reshape(B, out_ch, num, y.shape[-1], y.shape[-2])
    return y, (x2, w2)


if __name__ == "__main__":
    B, in_channels, out_channels = 2, 2, 4
    order, kernel_size, padding = 4, 3, 1
    H = W = 16

    group = CyclicGroup(order)
    transformed_grid = create_transformed_grid_R2xH(group, kernel_size)

    key = jax.random.PRNGKey(0)
    kx, kw = jax.random.split(key)
    # kaiming_uniform_(a=sqrt(5)) on [out, in, |H|, k, k] -> U(-1/sqrt(fan_in), 1/sqrt(fan_in))
    fan_in = in_channels * order * kernel_size * kernel_size
    bound = 1.0 / math.sqrt(fan_in)
    weight = jax.random.uniform(kw, (out_channels, in_channels, order, kernel_size, kernel_size),
                                jnp.float32, -bound, bound)
    x = jax.random.normal(kx, (B, in_channels, order, H, W), jnp.float32)

    y, (x2, w2) = group_conv2d_forward(x, weight, transformed_grid, group,
                                       kernel_size, padding)
    y = jax.block_until_ready(y)

    # sanity check the Pallas conv against XLA's conv
    y_ref = jax.lax.conv_general_dilated(
        x2, w2, window_strides=(1, 1),
        padding=((padding, padding), (padding, padding)),
        dimension_numbers=("NCHW", "OIHW", "NCHW"),
        precision=jax.lax.Precision.HIGHEST)
    y_ref = y_ref.reshape(B, out_channels, order, y_ref.shape[-1], y_ref.shape[-2])
    assert y.shape == (B, out_channels, order, W, H), y.shape
    assert jnp.allclose(y, y_ref, rtol=1e-4, atol=1e-4), float(jnp.max(jnp.abs(y - y_ref)))

    print("KERNEL_OK")
</pallas_src>

<mosaic_0001>
module attributes {stable_mosaic.version = 11 : i64} {
  func.func @conv_kernel(%arg0: i32, %arg1: memref<1x8x432xf32, #tpu.memory_space<vmem>>, %arg2: memref<16x72xf32, #tpu.memory_space<vmem>>, %arg3: memref<1x16x384xf32, #tpu.memory_space<vmem>>, %arg4: memref<72x384xf32, #tpu.memory_space<vmem>>) attributes {dimension_semantics = [#tpu.dimension_semantics<parallel>], iteration_bounds = array<i64: 2>, scalar_prefetch = 0 : i64, scratch_operands = 1 : i64, tpu.core_type = #tpu.core_type<tc>, window_params = [{transform_indices = @transform_0, window_bounds = array<i64: 1, 8, 432>}, {pipeline_mode = #tpu.pipeline_mode<synchronous>, transform_indices = @transform_1, window_bounds = array<i64: 16, 72>}, {transform_indices = @transform_2, window_bounds = array<i64: 1, 16, 384>}]} {
    %c0 = arith.constant 0 : index
    %c0_0 = arith.constant 0 : index
    %c0_1 = arith.constant 0 : index
    %0 = vector.load %arg1[%c0, %c0_0, %c0_1] : memref<1x8x432xf32, #tpu.memory_space<vmem>>, vector<1x8x384xf32>
    %1 = vector.shape_cast %0 : vector<1x8x384xf32> to vector<8x384xf32>
    %c0_2 = arith.constant 0 : index
    %c0_3 = arith.constant 0 : index
    %2 = vector.load %arg4[%c0_2, %c0_3] : memref<72x384xf32, #tpu.memory_space<vmem>>, vector<8x384xf32>
    tpu.vector_store %arg4[%c0_2, %c0_3], %1 {strides = array<i32>} : memref<72x384xf32, #tpu.memory_space<vmem>>, vector<8x384xf32>,
    %c0_4 = arith.constant 0 : index
    %c0_5 = arith.constant 0 : index
    %c1 = arith.constant 1 : index
    %3 = vector.load %arg1[%c0_4, %c0_5, %c1] : memref<1x8x432xf32, #tpu.memory_space<vmem>>, vector<1x8x384xf32>
    %4 = vector.shape_cast %3 : vector<1x8x384xf32> to vector<8x384xf32>
    %c8 = arith.constant 8 : index
    %c0_6 = arith.constant 0 : index
    %5 = vector.load %arg4[%c8, %c0_6] : memref<72x384xf32, #tpu.memory_space<vmem>>, vector<8x384xf32>
    tpu.vector_store %arg4[%c8, %c0_6], %4 {strides = array<i32>} : memref<72x384xf32, #tpu.memory_space<vmem>>, vector<8x384xf32>,
    %c0_7 = arith.constant 0 : index
    %c0_8 = arith.constant 0 : index
    %c2 = arith.constant 2 : index
    %6 = vector.load %arg1[%c0_7, %c0_8, %c2] : memref<1x8x432xf32, #tpu.memory_space<vmem>>, vector<1x8x384xf32>
    %7 = vector.shape_cast %6 : vector<1x8x384xf32> to vector<8x384xf32>
    %c16 = arith.constant 16 : index
    %c0_9 = arith.constant 0 : index
    %8 = vector.load %arg4[%c16, %c0_9] : memref<72x384xf32, #tpu.memory_space<vmem>>, vector<8x384xf32>
    tpu.vector_store %arg4[%c16, %c0_9], %7 {strides = array<i32>} : memref<72x384xf32, #tpu.memory_space<vmem>>, vector<8x384xf32>,
    %c0_10 = arith.constant 0 : index
    %c0_11 = arith.constant 0 : index
    %c18 = arith.constant 18 : index
    %9 = vector.load %arg1[%c0_10, %c0_11, %c18] : memref<1x8x432xf32, #tpu.memory_space<vmem>>, vector<1x8x384xf32>
    %10 = vector.shape_cast %9 : vector<1x8x384xf32> to vector<8x384xf32>
    %c24 = arith.constant 24 : index
    %c0_12 = arith.constant 0 : index
    %11 = vector.load %arg4[%c24, %c0_12] : memref<72x384xf32, #tpu.memory_space<vmem>>, vector<8x384xf32>
    tpu.vector_store %arg4[%c24, %c0_12], %10 {strides = array<i32>} : memref<72x384xf32, #tpu.memory_space<vmem>>, vector<8x384xf32>,
    %c0_13 = arith.constant 0 : index
    %c0_14 = arith.constant 0 : index
    %c19 = arith.constant 19 : index
    %12 = vector.load %arg1[%c0_13, %c0_14, %c19] : memref<1x8x432xf32, #tpu.memory_space<vmem>>, vector<1x8x384xf32>
    %13 = vector.shape_cast %12 : vector<1x8x384xf32> to vector<8x384xf32>
    %c32 = arith.constant 32 : index
    %c0_15 = arith.constant 0 : index
    %14 = vector.load %arg4[%c32, %c0_15] : memref<72x384xf32, #tpu.memory_space<vmem>>, vector<8x384xf32>
    tpu.vector_store %arg4[%c32, %c0_15], %13 {strides = array<i32>} : memref<72x384xf32, #tpu.memory_space<vmem>>, vector<8x384xf32>,
    %c0_16 = arith.constant 0 : index
    %c0_17 = arith.constant 0 : index
    %c20 = arith.constant 20 : index
    %15 = vector.load %arg1[%c0_16, %c0_17, %c20] : memref<1x8x432xf32, #tpu.memory_space<vmem>>, vector<1x8x384xf32>
    %16 = vector.shape_cast %15 : vector<1x8x384xf32> to vector<8x384xf32>
    %c40 = arith.constant 40 : index
    %c0_18 = arith.constant 0 : index
    %17 = vector.load %arg4[%c40, %c0_18] : memref<72x384xf32, #tpu.memory_space<vmem>>, vector<8x384xf32>
    tpu.vector_store %arg4[%c40, %c0_18], %16 {strides = array<i32>} : memref<72x384xf32, #tpu.memory_space<vmem>>, vector<8x384xf32>,
    %c0_19 = arith.constant 0 : index
    %c0_20 = arith.constant 0 : index
    %c36 = arith.constant 36 : index
    %18 = vector.load %arg1[%c0_19, %c0_20, %c36] : memref<1x8x432xf32, #tpu.memory_space<vmem>>, vector<1x8x384xf32>
    %19 = vector.shape_cast %18 : vector<1x8x384xf32> to vector<8x384xf32>
    %c48 = arith.constant 48 : index
    %c0_21 = arith.constant 0 : index
    %20 = vector.load %arg4[%c48, %c0_21] : memref<72x384xf32, #tpu.memory_space<vmem>>, vector<8x384xf32>
    tpu.vector_store %arg4[%c48, %c0_21], %19 {strides = array<i32>} : memref<72x384xf32, #tpu.memory_space<vmem>>, vector<8x384xf32>,
    %c0_22 = arith.constant 0 : index
    %c0_23 = arith.constant 0 : index
    %c37 = arith.constant 37 : index
    %21 = vector.load %arg1[%c0_22, %c0_23, %c37] : memref<1x8x432xf32, #tpu.memory_space<vmem>>, vector<1x8x384xf32>
    %22 = vector.shape_cast %21 : vector<1x8x384xf32> to vector<8x384xf32>
    %c56 = arith.constant 56 : index
    %c0_24 = arith.constant 0 : index
    %23 = vector.load %arg4[%c56, %c0_24] : memref<72x384xf32, #tpu.memory_space<vmem>>, vector<8x384xf32>
    tpu.vector_store %arg4[%c56, %c0_24], %22 {strides = array<i32>} : memref<72x384xf32, #tpu.memory_space<vmem>>, vector<8x384xf32>,
    %c0_25 = arith.constant 0 : index
    %c0_26 = arith.constant 0 : index
    %c38 = arith.constant 38 : index
    %24 = vector.load %arg1[%c0_25, %c0_26, %c38] : memref<1x8x432xf32, #tpu.memory_space<vmem>>, vector<1x8x384xf32>
    %25 = vector.shape_cast %24 : vector<1x8x384xf32> to vector<8x384xf32>
    %c64 = arith.constant 64 : index
    %c0_27 = arith.constant 0 : index
    %26 = vector.load %arg4[%c64, %c0_27] : memref<72x384xf32, #tpu.memory_space<vmem>>, vector<8x384xf32>
    tpu.vector_store %arg4[%c64, %c0_27], %25 {strides = array<i32>} : memref<72x384xf32, #tpu.memory_space<vmem>>, vector<8x384xf32>,
    %c0_28 = arith.constant 0 : index
    %c0_29 = arith.constant 0 : index
    %27 = vector.load %arg2[%c0_28, %c0_29] : memref<16x72xf32, #tpu.memory_space<vmem>>, vector<16x72xf32>
    %c0_30 = arith.constant 0 : index
    %c0_31 = arith.constant 0 : index
    %28 = vector.load %arg4[%c0_30, %c0_31] : memref<72x384xf32, #tpu.memory_space<vmem>>, vector<72x384xf32>
    %cst = arith.constant dense<0.000000e+00> : vector<16x384xf32>
    %29 = tpu.matmul %27, %28, %cst {dimension_numbers = #tpu.dot_dimension_numbers<[1], [0], [0], [1], [0, 0, 1, 1], [], []>} : vector<16x72xf32>, vector<72x384xf32>, vector<16x384xf32> -> vector<16x384xf32>
    %c0_32 = arith.constant 0 : index
    %c0_33 = arith.constant 0 : index
    %c0_34 = arith.constant 0 : index
    %30 = vector.load %arg3[%c0_32, %c0_33, %c0_34] : memref<1x16x384xf32, #tpu.memory_space<vmem>>, vector<1x16x384xf32>
    %31 = vector.shape_cast %30 : vector<1x16x384xf32> to vector<16x384xf32>
    %32 = vector.shape_cast %29 : vector<16x384xf32> to vector<1x16x384xf32>
    tpu.vector_store %arg3[%c0_32, %c0_33, %c0_34], %32 {strides = array<i32>} : memref<1x16x384xf32, #tpu.memory_space<vmem>>, vector<1x16x384xf32>,
    return
  }
  func.func @transform_0(%arg0: i32) -> (i32, i32, i32) {
    %c0_i32 = arith.constant 0 : i32
    %c0_i32_0 = arith.constant 0 : i32
    %c0_i32_1 = arith.constant 0 : i32
    return %arg0, %c0_i32, %c0_i32_0 : i32, i32, i32
  }
  func.func @transform_1(%arg0: i32) -> (i32, i32) {
    %c0_i32 = arith.constant 0 : i32
    %c0_i32_0 = arith.constant 0 : i32
    %c0_i32_1 = arith.constant 0 : i32
    return %c0_i32, %c0_i32_0 : i32, i32
  }
  func.func @transform_2(%arg0: i32) -> (i32, i32, i32) {
    %c0_i32 = arith.constant 0 : i32
    %c0_i32_0 = arith.constant 0 : i32
    %c0_i32_1 = arith.constant 0 : i32
    return %arg0, %c0_i32, %c0_i32_0 : i32, i32, i32
  }
}

</mosaic_0001>

<bundles_post_ra>
// kernel: tpu_custom_call.1
= control target key start
LH: loop header
LB: loop body
LE: loop exit
PB: predicated region body
PF: predicated region fallthrough
CT: control target
= control target key end

     0   :  { %7 = vsyncpa [#allocation4], 0  ;;  %s1128_s0 = inlined_call_operand.hbm [shape: f32[2,8,432], index: 0, kind: input, shape index: {}]   ;;  %s1129_s1 = inlined_call_operand.hbm [shape: f32[16,72], index: 1, kind: input, shape index: {}]   ;;  %s1130_s2 = inlined_call_operand.hbm [shape: f32[2,16,384], index: 2, kind: output, shape index: {}]  }
   0x1   :  { %9 = vsyncpa [#allocation4 + $0x1], 0 }
   0x2   :  { %10 = vsyncpa [#allocation7], 0 }
   0x3   :  { %11 = vsyncpa [#allocation5], 0 }
   0x4   :  { %13 = vsyncpa [#allocation5 + $0x1], 0  ;;  %s943_s9 = smov 0   ;;  %s945_s10 = smov 0  }
   0x5   :  { %s947_s11 = smov 0   ;;  %s949_s12 = smov 0  }
   0x6 LB: > { %s108_s15 = sshll.u32 %s1129_s1, 4  ;;  %s967_s16 = sadd.s32 4294967295, %s913_s12   ;;  %s913_s12 = sphi %s949_s12, %s1140_s12   ;;  %s909_s11 = sphi %s947_s11, %s1139_s11   ;;  %s905_s10 = sphi %s945_s10, %s1138_s10   ;;  %s901_s9 = sphi %s943_s9, %s1137_s9   ;;  %s109_s15 = int_to_ptr.hbm [resolvable:$true] %s108_s15 }
   0x7   : > { %p604_p0 = scmp.ge.s32.totalorder %s913_s12, 1  ;;  %p40_p1 = scmp.eq.s32.totalorder %s967_s16, 0 }
   0x8   : > { %p97_p2 = scmp.lt.s32.totalorder %s913_s12, 3  ;;  %s915_s18 = smov [#allocation6]  }
   0x9   : > { %s110_s19 = sshll.u32 %s915_s18, 4  ;;  %s916_s20 = smov 128   ;;  %s111_s19 = int_to_ptr.vmem [resolvable:$true] %s110_s19 }
   0xa   : > { %p972_p3 = pnand %p604_p0, %p97_p2  ;;  %s917_s21 = smov 8  }
   0xb   : > { %s603_s22 = sadd.s32 4294967294, %s913_s12   ;;  %s983_s23 = sadd.s32 1, %s913_s12  }
   0xc   : > { %p642_p4 = pneg %p972_p3  ;;  %s26_s24 = sadd.s32 1, %s909_s11 }
   0xd   : > { %s23_s25 = ssub.s32 %s913_s12, %s983_s23  ;;  %p33_p7 = scmp.ne.s32.totalorder %s909_s11, %s905_s10 }
   0xe   : > { %p643_p6 = pnand %p642_p4, %p40_p1  ;;  %p24_p8 = scmp.eq.s32.totalorder %s23_s25, 0 }
   0xf   : > { %p34_p9 = scmp.eq.s32.totalorder %s913_s12, 0  ;;  %p39_p10 = scmp.ne.s32.totalorder %s905_s10, %s901_s9 }
  0x10   : > { %645 = dma.hbm_to_vmem [thread:$0]  (!%p643_p6), %s109_s15, 256, %s111_s19, [#allocation7], %s916_s20, %s916_s20, %s917_s21  }
  0x11   : > { %p84_p11 = scmp.eq.s32.totalorder %s967_s16, 1  ;;  %p999_p12 = por %p40_p1, %p39_p10 }
  0x12   : > { %s995_s26 = scalar_select %p24_p8, %s909_s11, %s26_s24  }
  0x13   : > { %p1003_p13 = por %p84_p11, %p33_p7  ;;  %p90_p0 = scmp.eq.s32.totalorder %s603_s22, 1 }
  0x14   : > { %p35_p2 = por %p34_p9, %p33_p7  ;;  %s124_s29 = sand.u32 1, %s909_s11  }
  0x15   : > { %p1008_p4 = por %p90_p0, %p39_p10  ;;  %p655_p6 = scmp.lt.s32.totalorder %s913_s12, 2 }
  0x16   : > { %s607_s3 = sshll.u32 %s124_s29, 5  ;;  %s622_s4 = sshll.u32 %s913_s12, 5 }
  0x17   : > { %s133_s7 = scalar_lea.hbm %s1128_s0, %s622_s4  ;;  %s128_s13 = scalar_lea.vmem [#allocation3], %s607_s3 }
  0x18   : > { %s135_s8 = sshll.u32 %s133_s7, 4  ;;  %s137_s14 = sshll.u32 %s128_s13, 4  ;;  %s136_s8 = int_to_ptr.hbm [resolvable:$true] %s135_s8  ;;  %s138_s14 = int_to_ptr.vmem [resolvable:$true] %s137_s14 }
  0x19   : > { %p1017_p8 = pnand %p655_p6, %p35_p2  ;;  %s125_s18 = scalar_lea.sflag [#allocation4], %s124_s29 }
  0x1a   : > { %s813_s19 = sshra.s32 %s136_s8, 4  ;;  %s820_s24 = scalar_lea.hbm %s1128_s0, 64  ;;  %s814_s19 = int_to_ptr.hbm [resolvable:$true] %s813_s19 }
  0x1b   : > { %s815_s20 = scalar_lea.hbm %s814_s19, 32  ;;  %p817_p9 = pneg %p1017_p8 }
  0x1c   : > { %p816_p7 = scmp.ne.s32.totalorder %s814_s19, %s815_s20  ;;  %p821_p0 = scmp.lt.s32.totalorder %s814_s19, %s1128_s0 }
  0x1d   : > { %p822_p2 = scmp.lt.s32.totalorder %s820_s24, %s815_s20 }
  0x1e   : > { %p818_p10 = pnand %p817_p9, %p816_p7 }
  0x1f   : > { %p823_p6 = por %p822_p2, %p821_p0 }
  0x20   : > { %p819_p11 = pneg %p818_p10 }
  0x22   : > { %p824_p5 = pnand %p823_p6, %p819_p11 }
  0x24   : > { %827 = shalt.err (!%p824_p5)
}
  0x25   : > { %649 = dma.hbm_to_vmem [thread:$0]  (!%p1017_p8), %s136_s8, 512, %s138_s14, %s125_s18  }
  0x26   : > { %146 = sbr.rel (%p972_p3) target bundleno = 349 (0x15d), region = 28  ;;  %s1034_s29 = sand.u32 (!%p972_p3), 1, %s905_s10  }
  0x27   : > { %s611_s4 = sshll.u32 (!%p972_p3), %s1034_s29, 5  ;;  %s149_s5 = scalar_lea.sflag (!%p972_p3), [#allocation4], %s1034_s29 }
  0x28   : > { %s152_s6 = scalar_lea.vmem (!%p972_p3), [#allocation3], %s611_s4 }
  0x2b   : > { %888 = dma.done.wait (%p999_p12), %s149_s5, 512  }
  0x2c   : > { %890 = vsyncadd (%p999_p12), %s149_s5, 4294966784 }
  0x2d   : > { %892 = dma.done.wait (%p40_p1), [#allocation7], 256  }
  0x2e   : > { %894 = vsyncadd (%p40_p1), [#allocation7], 4294967040  ;;  %v1046_v0 = vld [vmem:[%s152_s6 + $0x10] sm:$0xff]  ;;  %v370_v1 = vld [vmem:[%s152_s6 + $0x18] sm:$0xff]  ;;  %s918_s17 = smov 90   ;;  %s919_s27 = smov 92  }
  0x2f   : > { %v1048_v2 = vld [vmem:[%s152_s6] sm:$0xff]  ;;  %v703_v3 = vpack.i.bf16 %v370_v1, %v1046_v0  ;;  %v1051_v4 = vld [vmem:[%s152_s6 + $0x8] sm:$0xff]  ;;  %s920_s7 = smov 91   ;;  %s921_s8 = smov 108   ;;  %vm383_vm0 = vcmask 736256   ;;  %vm357_vm1 = vcmask 744448  }
  0x30   : > { %v723_v5 = vpack.i.bf16 %v1048_v2, %v1051_v4  ;;  %s922_s13 = smov 109   ;;  %s923_s14 = smov 110   ;;  %vm331_vm2 = vcmask 752640   ;;  %vm305_vm3 = vcmask 883712   ;;  %vm279_vm4 = vcmask 891904   ;;  %v393_v58 = vld [vmem:[#allocation6] sm:$0xff] }
  0x31   : > { %704 = vrot.lane.b32.xlu0 %v703_v3, %s918_s17  ;;  %714 = vrot.lane.b32.xlu1 %v703_v3, %s919_s27  ;;  %s924_s15 = smov 126   ;;  %s925_s18 = smov 127   ;;  %vm253_vm5 = vcmask 900096   ;;  %vm227_vm6 = vcmask 1031168   ;;  %vm201_vm7 = vcmask 1039360   ;;  %vm422_vm8 = vcmask 588800  }
  0x32   : > { %724 = vrot.lane.b32.xlu2 %v723_v5, %s918_s17  ;;  %s632_s19 = smul.u32 48, %s1034_s29 }
  0x33   : > { %s633_s21 = smul.u32 48, %s967_s16  ;;  %s505_s16 = scalar_lea.sflag [#allocation5], %s1034_s29 }
  0x34   : > { %s178_s20 = scalar_lea.vmem [#allocation8], %s632_s19 }
  0x35   : > { %s516_s25 = scalar_lea.hbm %s1130_s2, %s633_s21  ;;  %s517_s3 = sshll.u32 %s178_s20, 4  ;;  %s518_s3 = int_to_ptr.vmem [resolvable:$true] %s517_s3 }
  0x36   : > { %s519_s4 = sshll.u32 %s516_s25, 4  ;;  %s520_s4 = int_to_ptr.hbm [resolvable:$true] %s519_s4 }
  0x37   : > { %s857_s5 = sshra.s32 %s520_s4, 4  ;;  %s858_s5 = int_to_ptr.hbm [resolvable:$true] %s857_s5 }
  0x38   : > { %s859_s6 = scalar_lea.hbm %s858_s5, 48  ;;  %p864_p12 = scmp.lt.s32.totalorder %s858_s5, %s1130_s2 }
  0x39   : > { %709 = vrot.lane.b32.xlu0 %v703_v3, %s920_s7  ;;  %719 = vrot.lane.b32.xlu1 %v703_v3, %s921_s8  ;;  %p860_p1 = scmp.ne.s32.totalorder %s858_s5, %s859_s6 }
  0x3a   : > { %729 = vrot.lane.b32.xlu2 %v703_v3, %s922_s13 }
  0x3b   : > { %p861_p3 = pnand %p860_p1, %p1003_p13 }
  0x3d   : > { %p862_p5 = pneg %p861_p3 }
  0x41   : > { %734 = vrot.lane.b32.xlu0 %v723_v5, %s920_s7  ;;  %739 = vrot.lane.b32.xlu1 %v703_v3, %s923_s14  ;;  %s863_s7 = scalar_lea.hbm %s1130_s2, 96 }
  0x42   : > { %744 = vrot.lane.b32.xlu2 %v723_v5, %s919_s27  ;;  %p865_p8 = scmp.lt.s32.totalorder %s863_s7, %s859_s6 }
  0x44   : > { %p866_p7 = por %p865_p8, %p864_p12 }
  0x46   : > { %p867_p9 = pnand %p866_p7, %p862_p5 }
  0x49   : > { %754 = vrot.lane.b32.xlu1 %v723_v5, %s921_s8  ;;  %749 = vrot.lane.b32.xlu0 %v703_v3, %s924_s15 }
  0x4a   : > { %759 = vrot.lane.b32.xlu2 %v703_v3, %s925_s18 }
  0x51   : > { %769 = vrot.lane.b32.xlu1 %v723_v5, %s923_s14  ;;  %764 = vrot.lane.b32.xlu0 %v723_v5, %s922_s13 }
  0x52   : > { %774 = vrot.lane.b32.xlu2 %v723_v5, %s924_s15 }
  0x59   : > { %779 = vrot.lane.b32.xlu0 %v723_v5, %s925_s18 }
  0x8c   : > { %v725_v6 = vpop.permute.xlu2 %724 }
  0x8d   : > { %v727_v7 = vunpack.i.h.bf16 %v725_v6  ;;  %v726_v8 = vunpack.i.l.bf16 %v725_v6 }
  0x8f   : > { %v384_v9 = vsel %vm383_vm0, %v727_v7, %v726_v8 }
  0x90   : > { %436 = vmatpush.msra.mxu0 %v384_v9  ;;  %623 = vmatpush.msra.mxu3 %v384_v9 }
  0x94   : > { %v1055_v14 = vpop.permute.xlu2 %729 }
  0x95   : > { %v732_v25 = vunpack.i.h.bf16 %v1055_v14  ;;  %v731_v26 = vunpack.i.l.bf16 %v1055_v14 }
  0x97   : > { %v282_v32 = vsel %vm279_vm4, %v731_v26, %v732_v25 }
  0x9c   : > { %v745_v28 = vpop.permute.xlu2 %744 }
  0x9d   : > { %v747_v31 = vunpack.i.h.bf16 %v745_v28  ;;  %v746_v33 = vunpack.i.l.bf16 %v745_v28 }
  0x9f   : > { %v332_v43 = vsel %vm331_vm2, %v747_v31, %v746_v33 }
  0xa3   : > { %v705_v10 = vpop.permute.xlu0 %704  ;;  %v715_v11 = vpop.permute.xlu1 %714 }
  0xa4   : > { %v707_v12 = vunpack.i.h.bf16 %v705_v10  ;;  %v706_v13 = vunpack.i.l.bf16 %v705_v10  ;;  %v717_v17 = vunpack.i.h.bf16 %v715_v11  ;;  %v716_v18 = vunpack.i.l.bf16 %v715_v11  ;;  %v760_v44 = vpop.permute.xlu2 %759  ;;  %v394_v11 = vld [vmem:[#allocation6 + $0x8] sm:$0xff] }
  0xa5   : > { %v762_v46 = vunpack.i.h.bf16 %v760_v44  ;;  %v761_v47 = vunpack.i.l.bf16 %v760_v44 }
  0xa6   : > { %v385_v15 = vsel %vm383_vm0, %v726_v8, %v706_v13  ;;  %v386_v16 = vsel %vm383_vm0, %v706_v13, %v707_v12  ;;  %v334_v29 = vsel %vm331_vm2, %v716_v18, %v717_v17  ;;  %v333_v45 = vsel %vm331_vm2, %v746_v33, %v716_v18 }
  0xa7   : > { %459 = vmatpush.msra.mxu1 %v385_v15  ;;  %482 = vmatpush.msra.mxu2 %v386_v16  ;;  %v204_v57 = vsel %vm201_vm7, %v761_v47, %v762_v46 }
  0xab   : > { %v710_v19 = vpop.permute.xlu0 %709  ;;  %v720_v20 = vpop.permute.xlu1 %719 }
  0xac   : > { %v712_v21 = vunpack.i.h.bf16 %v710_v19  ;;  %v711_v22 = vunpack.i.l.bf16 %v710_v19  ;;  %v722_v23 = vunpack.i.h.bf16 %v720_v20  ;;  %v721_v24 = vunpack.i.l.bf16 %v720_v20  ;;  %v775_v59 = vpop.permute.xlu2 %774 }
  0xad   : > { %v777_v60 = vunpack.i.h.bf16 %v775_v59  ;;  %v776_v6 = vunpack.i.l.bf16 %v775_v59 }
  0xae   : > { %v360_v27 = vsel %vm357_vm1, %v711_v22, %v712_v21  ;;  %v308_v30 = vsel %vm305_vm3, %v721_v24, %v722_v23 }
  0xaf   : > { %483 = vmatpush.msra.mxu2 %v360_v27 }
  0xb1   : > { %484 = vmatpush.msra.mxu2 %v334_v29 }
  0xb3   : > { %v735_v34 = vpop.permute.xlu0 %734  ;;  %485 = vmatpush.msra.mxu2 %v308_v30  ;;  %v740_v35 = vpop.permute.xlu1 %739 }
  0xb4   : > { %v737_v36 = vunpack.i.h.bf16 %v735_v34  ;;  %v736_v37 = vunpack.i.l.bf16 %v735_v34  ;;  %v742_v38 = vunpack.i.h.bf16 %v740_v35  ;;  %v741_v39 = vunpack.i.l.bf16 %v740_v35 }
  0xb5   : > { %486 = vmatpush.msra.mxu2 %v282_v32 }
  0xb6   : > { %v358_v40 = vsel %vm357_vm1, %v737_v36, %v736_v37  ;;  %v359_v41 = vsel %vm357_vm1, %v736_v37, %v711_v22  ;;  %v256_v42 = vsel %vm253_vm5, %v741_v39, %v742_v38 }
  0xb7   : > { %437 = vmatpush.msra.mxu0 %v358_v40  ;;  %624 = vmatpush.msra.mxu3 %v358_v40 }
  0xb8   : > { %460 = vmatpush.msra.mxu1 %v359_v41  ;;  %487 = vmatpush.msra.mxu2 %v256_v42 }
  0xb9   : > { %438 = vmatpush.msra.mxu0 %v332_v43  ;;  %625 = vmatpush.msra.mxu3 %v332_v43 }
  0xba   : > { %461 = vmatpush.msra.mxu1 %v333_v45 }
  0xbb   : > { %v755_v48 = vpop.permute.xlu1 %754  ;;  %v750_v49 = vpop.permute.xlu0 %749 }
  0xbc   : > { %v757_v50 = vunpack.i.h.bf16 %v755_v48  ;;  %v756_v51 = vunpack.i.l.bf16 %v755_v48  ;;  %v752_v52 = vunpack.i.h.bf16 %v750_v49  ;;  %v751_v53 = vunpack.i.l.bf16 %v750_v49 }
  0xbe   : > { %v307_v54 = vsel %vm305_vm3, %v756_v51, %v721_v24  ;;  %v230_v55 = vsel %vm227_vm6, %v751_v53, %v752_v52  ;;  %v306_v56 = vsel %vm305_vm3, %v757_v50, %v756_v51  ;;  %v229_v12 = vsel %vm227_vm6, %v776_v6, %v751_v53 }
  0xbf   : > { %462 = vmatpush.msra.mxu1 %v307_v54  ;;  %488 = vmatpush.msra.mxu2 %v230_v55 }
  0xc0   : > { %439 = vmatpush.msra.mxu0 %v306_v56  ;;  %626 = vmatpush.msra.mxu3 %v306_v56 }
  0xc1   : > { %489 = vmatpush.msra.mxu2 %v204_v57 }
  0xc3   : > { %v770_v61 = vpop.permute.xlu1 %769  ;;  %v765_v62 = vpop.permute.xlu0 %764  ;;  %490 = vmatpush.msra.mxu2 %v1046_v0  ;;  %v228_v0 = vsel %vm227_vm6, %v777_v60, %v776_v6 }
  0xc4   : > { %v772_v63 = vunpack.i.h.bf16 %v770_v61  ;;  %v771_v1 = vunpack.i.l.bf16 %v770_v61  ;;  %v767_v3 = vunpack.i.h.bf16 %v765_v62  ;;  %v766_v5 = vunpack.i.l.bf16 %v765_v62  ;;  %617 = vmatmul.msk.f32.vlgmr.msra.gmra.mxu2 %vm422_vm8, %v393_v58 }
  0xc6   : > { %v280_v7 = vsel %vm279_vm4, %v767_v3, %v766_v5  ;;  %v281_v8 = vsel %vm279_vm4, %v766_v5, %v731_v26  ;;  %v254_v9 = vsel %vm253_vm5, %v772_v63, %v771_v1  ;;  %v255_v10 = vsel %vm253_vm5, %v771_v1, %v741_v39 }
  0xc7   : > { %440 = vmatpush.msra.mxu0 %v280_v7  ;;  %627 = vmatpush.msra.mxu3 %v280_v7 }
  0xc8   : > { %463 = vmatpush.msra.mxu1 %v281_v8 }
  0xc9   : > { %441 = vmatpush.msra.mxu0 %v254_v9  ;;  %628 = vmatpush.msra.mxu3 %v254_v9 }
  0xca   : > { %464 = vmatpush.msra.mxu1 %v255_v10 }
  0xcb   : > { %v780_v13 = vpop.permute.xlu0 %779  ;;  %442 = vmatpush.msra.mxu0 %v228_v0  ;;  %629 = vmatpush.msra.mxu3 %v228_v0 }
  0xcc   : > { %465 = vmatpush.msra.mxu1 %v229_v12  ;;  %v782_v14 = vunpack.i.h.bf16 %v780_v13  ;;  %v781_v15 = vunpack.i.l.bf16 %v780_v13  ;;  %618 = vmatmul.msk.f32.gmra.mxu2 %vm422_vm8, %v394_v11 }
  0xce   : > { %v202_v16 = vsel %vm201_vm7, %v782_v14, %v781_v15  ;;  %v203_v17 = vsel %vm201_vm7, %v781_v15, %v761_v47 }
  0xcf   : > { %443 = vmatpush.msra.mxu0 %v202_v16  ;;  %630 = vmatpush.msra.mxu3 %v202_v16 }
  0xd0   : > { %466 = vmatpush.msra.mxu1 %v203_v17 }
  0xd1   : > { %631 = vmatpush.msra.mxu3 %v1048_v2  ;;  %444 = vmatpush.msra.mxu0 %v1048_v2 }
  0xd2   : > { %467 = vmatpush.msra.mxu1 %v1051_v4  ;;  %614 = vmatmul.msk.f32.vlgmr.msra.gmra.mxu3 %vm422_vm8, %v394_v11 }
  0xd3   : > { %615 = vmatmul.msk.f32.vlgmr.msra.gmra.mxu1 %vm422_vm8, %v393_v58  ;;  %613 = vmatmul.msk.f32.vlgmr.msra.gmra.mxu0 %vm422_vm8, %v393_v58 }
  0xdb   : > { %616 = vmatmul.msk.f32.gmra.mxu1 %vm422_vm8, %v394_v11 }
 0x147   : > { %v492_v18 = vpop.f32.mrf.mxu2 }
 0x148   : > { %500 = vst [vmem:[%s178_s20 + $0x10] sm:$0xff] %v492_v18 }
 0x14f   : > { %v495_v19 = vpop.f32.mrf.mxu2 }
 0x150   : > { %v469_v20 = vpop.f32.mrf.mxu1  ;;  %v446_v21 = vpop.f32.mrf.mxu0  ;;  %503 = vst [vmem:[%s178_s20 + $0x28] sm:$0xff] %v495_v19 }
 0x151   : > { %499 = vst [vmem:[%s178_s20 + $0x8] sm:$0xff] %v469_v20 }
 0x152   : > { %498 = vst [vmem:[%s178_s20] sm:$0xff] %v446_v21 }
 0x155   : > { %v449_v2 = vpop.f32.mrf.mxu3 }
 0x156   : > { %501 = vst [vmem:[%s178_s20 + $0x18] sm:$0xff] %v449_v2 }
 0x158   : > { %v472_v4 = vpop.f32.mrf.mxu1 }
 0x159   : > { %502 = vst [vmem:[%s178_s20 + $0x20] sm:$0xff] %v472_v4 }
 0x15a   : > { %870 = shalt.err (!%p867_p9)
}
 0x15b   : > { %s926_s29 = smov 384   ;;  %s927_s14 = smov 24  }
 0x15c   : > { %640 = dma.vmem_to_hbm [thread:$0]  (%p1003_p13), %s518_s3, 768, %s520_s4, %s505_s16, %s926_s29, %s926_s29, %s927_s14  }
 0x15d PF: > { %s534_s15 = sand.u32 1, %s901_s9   ;;  %p1136_p10 = scmp.ge.s32.totalorder %s913_s12, 2 }
 0x15e   : > { %s535_s18 = scalar_lea.sflag [#allocation5], %s534_s15 }
 0x15f   : > { %p651_p11 = pnand %p1136_p10, %p1008_p4 }
 0x161   : > { %p652_p0 = pneg %p651_p11 }
 0x163   : > { %896 = dma.done.wait (%p652_p0), %s535_s18, 768  }
 0x164   : > { %898 = vsyncadd (%p652_p0), %s535_s18, 4294966528  ;;  %p16_p2 = scmp.ge.s32.totalorder %s983_s23, 4   ;;  %s1137_s9 = smov %s905_s10 }
 0x165   : > { %s1138_s10 = smov %s909_s11  ;;  %s1139_s11 = smov %s995_s26 }
 0x166   : > { %s1140_s12 = smov %s983_s23  ;;  %18 = sbr.rel (!%p16_p2) target bundleno = 6 (0x6), region = 77 }
 0x16b   :  { %541 = vsyncpa [#allocation4], 1 }
 0x16c   :  { %543 = vsyncpa [#allocation4 + $0x1], 1 }
 0x16d   :  { %544 = vsyncpa [#allocation7], 1 }
 0x16e   :  { %545 = vsyncpa [#allocation5], 1 }
 0x16f   :  { %547 = vsyncpa [#allocation5 + $0x1], 1 }

</bundles_post_ra>
